<compile_context>
chip_gen: v5e
topology: v5e:2x2
jax: 0.10.0
libtpu: 0.0.40
codegen_flags: <defaults>
</compile_context>

<pallas_src>
import jax
import jax.numpy as jnp
import numpy as np
from jax.experimental import pallas as pl
from jax.experimental.pallas import tpu as pltpu

# Small shapes consistent with the module's forward: (batch, seq, d_model).
B, S, D_MODEL = 2, 8, 32
MAX_LEN = 64
SCALE = 10000

_LANE = 128
_VMEM_TILE_BUDGET = 8 * 1024 * 1024  # per-grid-step VMEM budget (bytes), incl. double buffering


def pe_add_kernel(x_ref, pe_ref, out_ref):
    # x_ref: (B, tile_cols); pe_ref: (1, tile_cols) broadcasts over the batch rows (VPU add).
    out_ref[...] = (x_ref[...] + pe_ref[...]).astype(out_ref.dtype)


def make_pe_buffer(d_model=D_MODEL, max_len=MAX_LEN, scale=SCALE):
    """Sinusoidal positional-encoding buffer (1, max_len, d_model), mirroring the
    PyTorch __init__ register_buffer (even d_model, as the PyTorch code requires)."""
    position = jnp.arange(max_len, dtype=jnp.float32)[:, None]                 # (L, 1)
    div_term = jnp.exp(jnp.arange(0, d_model, 2, dtype=jnp.float32)
                       * (-(jnp.log(jnp.float32(scale)) / d_model)))           # (E/2,)
    ang = position * div_term                                                  # (L, E/2)
    # Interleave so pe[:, 0::2] = sin, pe[:, 1::2] = cos.
    pe = jnp.stack([jnp.sin(ang), jnp.cos(ang)], axis=-1).reshape(max_len, d_model)
    return pe[None].astype(jnp.float32)                                        # (1, L, E)


def _choose_tile_cols(total_cols, batch, dtype_bytes):
    """Largest lane-aligned column tile whose double-buffered VMEM footprint fits budget."""
    # Per-step VMEM ~= 2 buffers * (x_tile + out_tile + pe_tile).
    per_col = 2 * (2 * batch + 1) * dtype_bytes
    tile = max(_LANE, (_VMEM_TILE_BUDGET // per_col) // _LANE * _LANE)
    if total_cols <= tile:
        return total_cols
    return tile


def _positional_encoding_impl(x, pe):
    """x: (B, S, E); pe: (1, max_len, E). Returns x + pe[:, :S] (eval-mode dropout)."""
    b, s, e = x.shape
    max_len = pe.shape[1]
    total_cols = s * e

    # Lane-dense flattened views (metadata-only reshapes, row-major contiguous).
    x2 = x.reshape(b, total_cols)
    pe2 = pe.astype(x.dtype).reshape(1, max_len * e)

    tile_cols = _choose_tile_cols(total_cols, b, x.dtype.itemsize)
    if tile_cols == total_cols and total_cols % _LANE != 0:
        # Rare fallback for awkward shapes: make pe's full lane dim equal the block shape.
        pe2 = jax.lax.slice(pe2, (0, 0), (1, total_cols))

    grid = (pl.cdiv(total_cols, tile_cols),)

    out2 = pl.pallas_call(
        pe_add_kernel,
        out_shape=jax.ShapeDtypeStruct((b, total_cols), x.dtype),
        grid=grid,
        in_specs=[
            pl.BlockSpec((b, tile_cols), lambda j: (0, j)),    # x tile
            pl.BlockSpec((1, tile_cols), lambda j: (0, j)),    # pe tile = first S*E cols of buffer
        ],
        out_specs=pl.BlockSpec((b, tile_cols), lambda j: (0, j)),
        input_output_aliases={0: 0},                           # out reuses x's buffer (x += pe)
        compiler_params=pltpu.CompilerParams(
            dimension_semantics=("parallel",),
            vmem_limit_bytes=32 * 1024 * 1024,
        ),
    )(x2, pe2)
    return out2.reshape(b, s, e)


positional_encoding = jax.jit(_positional_encoding_impl)


def reference(x, pe):
    """Pure-JAX reference mirroring the PyTorch forward (eval mode)."""
    return x + pe[:, : x.shape[1]]


if __name__ == "__main__":
    key = jax.random.PRNGKey(0)
    x = jax.random.normal(key, (B, S, D_MODEL), dtype=jnp.float32)
    pe = make_pe_buffer()

    out = positional_encoding(x, pe)
    jax.block_until_ready(out)

    ref = reference(x, pe)
    np.testing.assert_allclose(np.asarray(out), np.asarray(ref), rtol=1e-6, atol=1e-6)
    print("KERNEL_OK")
</pallas_src>

<mosaic_0001>
module attributes {stable_mosaic.version = 11 : i64} {
  func.func @pe_add_kernel(%arg0: i32, %arg1: memref<2x256xf32, #tpu.memory_space<vmem>>, %arg2: memref<1x256xf32, #tpu.memory_space<vmem>>, %arg3: memref<2x256xf32, #tpu.memory_space<vmem>>) attributes {dimension_semantics = [#tpu.dimension_semantics<parallel>], iteration_bounds = array<i64: 1>, scalar_prefetch = 0 : i64, scratch_operands = 0 : i64, tpu.core_type = #tpu.core_type<tc>, window_params = [{transform_indices = @transform_0, window_bounds = array<i64: 2, 256>}, {transform_indices = @transform_1, window_bounds = array<i64: 1, 256>}, {transform_indices = @transform_2, window_bounds = array<i64: 2, 256>}]} {
    %c0 = arith.constant 0 : index
    %c0_0 = arith.constant 0 : index
    %0 = vector.load %arg1[%c0, %c0_0] : memref<2x256xf32, #tpu.memory_space<vmem>>, vector<2x256xf32>
    %c0_1 = arith.constant 0 : index
    %c0_2 = arith.constant 0 : index
    %1 = vector.load %arg2[%c0_1, %c0_2] : memref<1x256xf32, #tpu.memory_space<vmem>>, vector<1x256xf32>
    %2 = vector.broadcast %1 : vector<1x256xf32> to vector<2x256xf32>
    %3 = arith.addf %0, %2 : vector<2x256xf32>
    %c0_3 = arith.constant 0 : index
    %c0_4 = arith.constant 0 : index
    %4 = vector.load %arg3[%c0_3, %c0_4] : memref<2x256xf32, #tpu.memory_space<vmem>>, vector<2x256xf32>
    tpu.vector_store %arg3[%c0_3, %c0_4], %3 {strides = array<i32>} : memref<2x256xf32, #tpu.memory_space<vmem>>, vector<2x256xf32>,
    return
  }
  func.func @transform_0(%arg0: i32) -> (i32, i32) {
    %c0_i32 = arith.constant 0 : i32
    %c0_i32_0 = arith.constant 0 : i32
    return %c0_i32, %arg0 : i32, i32
  }
  func.func @transform_1(%arg0: i32) -> (i32, i32) {
    %c0_i32 = arith.constant 0 : i32
    %c0_i32_0 = arith.constant 0 : i32
    return %c0_i32, %arg0 : i32, i32
  }
  func.func @transform_2(%arg0: i32) -> (i32, i32) {
    %c0_i32 = arith.constant 0 : i32
    %c0_i32_0 = arith.constant 0 : i32
    return %c0_i32, %arg0 : i32, i32
  }
}

</mosaic_0001>

<bundles_post_ra>
// kernel: _positional_encoding_impl.1
= control target key start
LH: loop header
LB: loop body
LE: loop exit
PB: predicated region body
PF: predicated region fallthrough
CT: control target
= control target key end

     0   :  { %vm17_vm0 = vcmask 1041408   ;;  %s50_s1 = inlined_call_operand.vmem [shape: f32[1,2048], index: 1, kind: input, shape index: {}]   ;;  %s51_s0 = inlined_call_operand.vmem [shape: f32[2,256], index: 0, kind: input, shape index: {}, may-alias: {0,2}]   ;;  %s52_s2 = inlined_call_operand.vmem [shape: f32[2,256], index: 2, kind: output, shape index: {}, may-alias: {0,2}]  }
   0x1   :  { %v12_v0 = vld [vmem:[%s50_s1] sm:$0x3] }
   0x2   :  { %v14_v1 = vperm.slane %v12_v0, 0  ;;  %v15_v2 = vperm.slane %v12_v0, 1  ;;  %v11_v3 = vld [vmem:[%s51_s0] sm:$0xf] }
   0x4   :  { %v16_v4 = vrot.slane %v15_v2, 6 }
   0x6   :  { %v18_v5 = vsel %vm17_vm0, %v14_v1, %v16_v4 }
   0x7   :  { %v20_v6 = vadd.f32 %v18_v5, %v11_v3 }
   0x9   :  { %21 = vst [vmem:[%s52_s2] sm:$0xf] %v20_v6 }

</bundles_post_ra>
